<compile_context>
chip_gen: v7x
topology: tpu7x:2x2x1
jax: 0.10.0
libtpu: 0.0.40
codegen_flags: <defaults>
</compile_context>

<pallas_src>
import functools
import math

import jax
import jax.numpy as jnp
from jax.experimental import pallas as pl
from jax.experimental.pallas import tpu as pltpu


# ---------------------------------------------------------------------------
# Generation-gated sizing
# ---------------------------------------------------------------------------

_BUDGET_OVERRIDE = None   # test hook: force tiny tiles to exercise ragged grids


def _set_budget_override(cfg):
    # NOTE: only affects shapes that have not been jit-traced yet.
    global _BUDGET_OVERRIDE
    _BUDGET_OVERRIDE = cfg


@functools.lru_cache(maxsize=None)
def _tpu_generation():
    try:
        kind = jax.devices()[0].device_kind.lower()
    except Exception:
        return 0
    for g in (7, 6, 5, 4, 3, 2):
        if f"v{g}" in kind or f"tpu{g}" in kind:
            return g
    return 0


def _budgets():
    """Per-generation VMEM stream budget / scoped limit / tiling knobs."""
    if _BUDGET_OVERRIDE is not None:
        return dict(_BUDGET_OVERRIDE)
    gen = _tpu_generation()
    if gen in (5, 6):
        # 128 MiB physical VMEM, 1 TensorCore: big tiles amortize the
        # ~0.35 us per-grid-step overhead.
        return dict(stream=24 << 20, vmem_limit=80 << 20, max_lane=32768,
                    min_steps=1, input_buffers=2)
    if gen >= 7:
        # 64 MiB VMEM per TensorCore, 2 TCs, 3.2 TB/s HBM: modest stream
        # budget, make sure both cores get grid steps, third input buffer to
        # hide DMA-issue overhead on fast short steps.
        return dict(stream=14 << 20, vmem_limit=48 << 20, max_lane=16384,
                    min_steps=4, input_buffers=3)
    # Unknown / older generations: conservative.
    return dict(stream=12 << 20, vmem_limit=40 << 20, max_lane=16384,
                min_steps=1, input_buffers=2)


def _cdiv(a, b):
    return -(-a // b)


def _round_down(x, unit):
    return (x // unit) * unit


def _pick_tile(dim, unit, cap):
    """Largest legal tile <= cap: either the full dim (always legal) or a
    multiple of `unit`.  Non-divisible dims are handled by the cdiv grid's
    ragged edge blocks -- no padding pass is ever needed."""
    cap = max(unit, _round_down(cap, unit))
    if dim <= cap:
        return dim
    return cap


def _shrink_for_steps(dim, tile, unit, other_steps, min_steps):
    """Halve `tile` (keeping it a multiple of `unit`) until the grid has at
    least `min_steps` steps, so both v7x TensorCores get work."""
    while other_steps * _cdiv(dim, tile) < min_steps:
        cand = _round_down(max(unit, tile // 2), unit)
        if cand >= tile or cand < unit:
            break
        tile = cand
    return tile


def _stream_spec(shape, index_map, buffers):
    """BlockSpec for a streamed operand, with optional deeper buffering."""
    if buffers and buffers != 2:
        try:
            return pl.BlockSpec(shape, index_map,
                                pipeline_mode=pl.Buffered(buffers))
        except Exception:          # pipeline_mode unavailable: default buffering
            pass
    return pl.BlockSpec(shape, index_map)


# ---------------------------------------------------------------------------
# Kernels
# ---------------------------------------------------------------------------

def _conv_flat_kernel(w_ref, b_ref, x_ref, y_ref, o_ref):
    # (Cout, Cin) @ (Cin, TM) on the MXU -> lane-dense (Cout, TM) tile.
    # Bias + residual adds are VPU filler under the mem-bound regime.
    acc = jnp.dot(w_ref[...], x_ref[0], preferred_element_type=jnp.float32)
    acc = acc + b_ref[...] + y_ref[0].astype(jnp.float32)
    o_ref[0] = acc.astype(o_ref.dtype)


def _conv_strided_kernel(s, th, wo, w_ref, b_ref, x_ref, y_ref, o_ref):
    # x block: th*s contiguous input rows x full input width (wo*s).  The
    # stride-s row/column decimation happens in-register, so the strided 1x1
    # conv needs no pre-kernel gather pass over x.
    cin = w_ref.shape[1]
    xt = x_ref[0]                                           # (Cin, th*s, wo*s)
    xt = xt.reshape(cin, th, s, wo, s)[:, :, 0, :, 0]       # (Cin, th, wo)
    xt = xt.reshape(cin, th * wo)                           # (Cin, TM)
    acc = jnp.dot(w_ref[...], xt, preferred_element_type=jnp.float32)
    acc = acc + b_ref[...] + y_ref[0].astype(jnp.float32)
    o_ref[0] = acc.astype(o_ref.dtype)


def _add_kernel(x_ref, y_ref, o_ref):
    o_ref[...] = (x_ref[...] + y_ref[...]).astype(o_ref.dtype)


# ---------------------------------------------------------------------------
# Wrappers
# ---------------------------------------------------------------------------

@jax.jit
def _conv1x1_add_flat(x, y, weight, bias):
    """1x1 conv (stride already applied to x) + residual, NCHW-native:
    channels on sublanes, flattened spatial on lanes."""
    N, Cin, H, W = x.shape
    Cout = weight.shape[0]
    assert y.shape == (N, Cout, H, W), (y.shape, (N, Cout, H, W))
    M = H * W
    out_dtype = jnp.result_type(x.dtype, y.dtype)

    x3 = x.reshape(N, Cin, M)          # free: contiguous NCHW views
    y3 = y.reshape(N, Cout, M)
    w2 = weight.reshape(Cout, Cin)     # stays f32: full-precision accumulate
    b2 = bias.reshape(Cout, 1).astype(jnp.float32)

    cfg = _budgets()
    item = jnp.dtype(x.dtype).itemsize
    # Budget only the double-buffered x/y/out streams; weight & bias are
    # resident and tiny for a 1x1 conv.
    per_lane = 2 * (Cin + 2 * Cout) * item
    lane_cap = min(cfg["max_lane"], max(128, cfg["stream"] // max(per_lane, 1)))
    tm = _pick_tile(M, 128, lane_cap)
    tm = _shrink_for_steps(M, tm, 128, N, cfg["min_steps"])
    grid = (N, _cdiv(M, tm))

    cost = pl.CostEstimate(
        flops=2 * N * M * Cin * Cout,
        transcendentals=0,
        bytes_accessed=item * N * M * (Cin + 2 * Cout) + 4 * Cout * (Cin + 1))

    out3 = pl.pallas_call(
        _conv_flat_kernel,
        out_shape=jax.ShapeDtypeStruct((N, Cout, M), out_dtype),
        grid_spec=pltpu.PrefetchScalarGridSpec(
            num_scalar_prefetch=0,
            grid=grid,
            in_specs=[
                pl.BlockSpec((Cout, Cin), lambda n, j: (0, 0)),   # weight (resident)
                pl.BlockSpec((Cout, 1), lambda n, j: (0, 0)),     # bias   (resident)
                _stream_spec((1, Cin, tm), lambda n, j: (n, 0, j),
                             cfg["input_buffers"]),
                _stream_spec((1, Cout, tm), lambda n, j: (n, 0, j),
                             cfg["input_buffers"]),
            ],
            out_specs=pl.BlockSpec((1, Cout, tm), lambda n, j: (n, 0, j)),
        ),
        compiler_params=pltpu.CompilerParams(
            dimension_semantics=("parallel", "parallel"),
            vmem_limit_bytes=cfg["vmem_limit"]),
        cost_estimate=cost,
    )(w2, b2, x3, y3)
    return out3.reshape(N, Cout, H, W)


@functools.partial(jax.jit, static_argnames=("subsample",))
def _conv1x1_add_fused(x, y, weight, bias, *, subsample):
    """Strided 1x1 conv + residual with the stride-s subsample fused into the
    kernel (no pre-kernel gather pass over x)."""
    s = subsample
    N, Cin, H, W = x.shape
    Cout = weight.shape[0]
    assert H % s == 0 and W % s == 0
    Ho, Wo = H // s, W // s
    assert y.shape == (N, Cout, Ho, Wo), (y.shape, (N, Cout, Ho, Wo))
    M = Ho * Wo
    out_dtype = jnp.result_type(x.dtype, y.dtype)

    y3 = y.reshape(N, Cout, M)
    w2 = weight.reshape(Cout, Cin)
    b2 = bias.reshape(Cout, 1).astype(jnp.float32)

    cfg = _budgets()
    item = jnp.dtype(x.dtype).itemsize
    # Output-row tile `th`: the flattened (Cout, th*Wo) output block must be
    # lane-dense (th*Wo % 128 == 0) and the x block sublane dim th*s a
    # multiple of 8 -- unless the blocks cover the full dims (th == Ho).
    q = 128 // math.gcd(Wo, 128)
    step = (8 * q) // math.gcd(8, q)                # lcm(8, q)
    per_row = 2 * (Cin * s * s + 2 * Cout) * Wo * item   # dbl-buffered streams
    budget_rows = max(1, cfg["stream"] // max(per_row, 1))
    if Ho <= step or Ho <= budget_rows:
        th = Ho
    else:
        th = max(step, _round_down(budget_rows, step))
    th = _shrink_for_steps(Ho, th, step, N, cfg["min_steps"])
    if per_row * th + 8 * Cout * (Cin + 1) > 0.9 * cfg["vmem_limit"]:
        raise ValueError("fused shortcut tile does not fit in VMEM")

    tm = th * Wo
    grid = (N, _cdiv(Ho, th))

    cost = pl.CostEstimate(
        flops=2 * N * M * Cin * Cout,
        transcendentals=0,
        bytes_accessed=item * N * (Cin * H * W + 2 * Cout * M)
                       + 4 * Cout * (Cin + 1))

    out3 = pl.pallas_call(
        functools.partial(_conv_strided_kernel, s, th, Wo),
        out_shape=jax.ShapeDtypeStruct((N, Cout, M), out_dtype),
        grid_spec=pltpu.PrefetchScalarGridSpec(
            num_scalar_prefetch=0,
            grid=grid,
            in_specs=[
                pl.BlockSpec((Cout, Cin), lambda n, j: (0, 0)),   # weight
                pl.BlockSpec((Cout, 1), lambda n, j: (0, 0)),     # bias
                _stream_spec((1, Cin, th * s, W), lambda n, j: (n, 0, j, 0),
                             cfg["input_buffers"]),
                _stream_spec((1, Cout, tm), lambda n, j: (n, 0, j),
                             cfg["input_buffers"]),
            ],
            out_specs=pl.BlockSpec((1, Cout, tm), lambda n, j: (n, 0, j)),
        ),
        compiler_params=pltpu.CompilerParams(
            dimension_semantics=("parallel", "parallel"),
            vmem_limit_bytes=cfg["vmem_limit"]),
        cost_estimate=cost,
    )(w2, b2, x, y3)
    return out3.reshape(N, Cout, Ho, Wo)


@jax.jit
def _plain_add(x, y):
    """Tiled, lane-dense elementwise add (identity shortcut path)."""
    assert x.shape == y.shape, (x.shape, y.shape)
    N, C, H, W = x.shape
    out_dtype = jnp.result_type(x.dtype, y.dtype)
    R, L = N * C, H * W
    x2 = x.reshape(R, L)
    y2 = y.reshape(R, L)

    cfg = _budgets()
    item = jnp.dtype(out_dtype).itemsize
    tl = _pick_tile(L, 128, cfg["max_lane"])
    row_cap = max(8, cfg["stream"] // max(6 * tl * item, 1))   # x+y+out, x2 bufs
    tr = _pick_tile(R, 8, row_cap)
    # Give both v7x TensorCores work; shrink rows first so the lane-dense
    # tile width is preserved as long as possible.
    tr = _shrink_for_steps(R, tr, 8, _cdiv(L, tl), cfg["min_steps"])
    tl = _shrink_for_steps(L, tl, 128, _cdiv(R, tr), cfg["min_steps"])
    grid = (_cdiv(R, tr), _cdiv(L, tl))

    out2 = pl.pallas_call(
        _add_kernel,
        out_shape=jax.ShapeDtypeStruct((R, L), out_dtype),
        grid_spec=pltpu.PrefetchScalarGridSpec(
            num_scalar_prefetch=0,
            grid=grid,
            in_specs=[
                _stream_spec((tr, tl), lambda i, j: (i, j), cfg["input_buffers"]),
                _stream_spec((tr, tl), lambda i, j: (i, j), cfg["input_buffers"]),
            ],
            out_specs=pl.BlockSpec((tr, tl), lambda i, j: (i, j)),
        ),
        compiler_params=pltpu.CompilerParams(
            dimension_semantics=("parallel", "parallel"),
            vmem_limit_bytes=cfg["vmem_limit"]),
    )(x2, y2)
    return out2.reshape(N, C, H, W)


# ---------------------------------------------------------------------------
# Module
# ---------------------------------------------------------------------------

class Shortcut:
    """JAX/Pallas port of _Shortcut."""

    def __init__(self, in_filters, nb_filters, subsample=1, key=None):
        self.in_filters = in_filters
        self.nb_filters = nb_filters
        self.subsample = subsample
        self.process = (in_filters != nb_filters) or (subsample != 1)
        self.weight = None
        self.bias = None
        self._fused_ok = True
        if self.process:
            if key is None:
                key = jax.random.PRNGKey(42)
            kw, kb = jax.random.split(key)
            # PyTorch Conv2d default init: U(-1/sqrt(fan_in), 1/sqrt(fan_in)),
            # fan_in = in_filters for a 1x1 kernel.
            bound = 1.0 / (in_filters ** 0.5)
            self.weight = jax.random.uniform(
                kw, (nb_filters, in_filters, 1, 1), jnp.float32, -bound, bound)
            self.bias = jax.random.uniform(
                kb, (nb_filters,), jnp.float32, -bound, bound)

    def __call__(self, x, y):
        if not self.process:
            return _plain_add(x, y)
        s = self.subsample
        H, W = x.shape[2], x.shape[3]
        if s != 1 and self._fused_ok and H % s == 0 and W % s == 0:
            try:
                return _conv1x1_add_fused(x, y, self.weight, self.bias,
                                          subsample=s)
            except Exception:
                # Mosaic could not lower the in-kernel stride-s decimation on
                # this backend (or the tile did not fit VMEM): fall back to
                # the pre-sliced flat path and stop retrying.
                self._fused_ok = False
        if s != 1:
            # Strided spatial subsample as an XLA pre-pass (fallback / uneven
            # spatial dims); still shrinks the data s**2-fold before the
            # kernel reads it.
            x = x[:, :, ::s, ::s]
        return _conv1x1_add_flat(x, y, self.weight, self.bias)


def _reference(mod, x, y):
    """Pure-JAX reference (lax conv) for correctness checking."""
    if not mod.process:
        return x + y
    y0 = jax.lax.conv_general_dilated(
        x, mod.weight,
        window_strides=(mod.subsample, mod.subsample),
        padding="VALID",
        dimension_numbers=("NCHW", "OIHW", "NCHW"),
    ) + mod.bias.reshape(1, -1, 1, 1)
    return y0 + y


# ---------------------------------------------------------------------------
# Self-test
# ---------------------------------------------------------------------------

if __name__ == "__main__":
    key = jax.random.PRNGKey(0)
    keys = jax.random.split(key, 12)

    def check(out, ref, tol=1e-5):
        assert out.shape == ref.shape, (out.shape, ref.shape)
        err = float(jnp.max(jnp.abs(out - ref)))
        assert err <= tol, err

    # Case 1: projection shortcut (channel change + stride 2) -> fused path.
    N, Cin, Cout, H, W, s = 2, 4, 8, 16, 16, 2
    x = jax.random.normal(keys[0], (N, Cin, H, W), jnp.float32)
    y = jax.random.normal(keys[1], (N, Cout, H // s, W // s), jnp.float32)
    mod = Shortcut(Cin, Cout, subsample=s)
    out = mod(x, y)
    jax.block_until_ready(out)
    check(out, _reference(mod, x, y))

    # Case 2: channel projection only (stride 1) -> flat lane-dense conv path.
    x = jax.random.normal(keys[2], (N, Cin, H, W), jnp.float32)
    y = jax.random.normal(keys[3], (N, Cout, H, W), jnp.float32)
    mod = Shortcut(Cin, Cout, subsample=1)
    out = mod(x, y)
    jax.block_until_ready(out)
    check(out, _reference(mod, x, y))

    # Case 3: identity shortcut -> tiled plain add.
    a = jax.random.normal(keys[4], (N, Cin, H, W), jnp.float32)
    b = jax.random.normal(keys[5], (N, Cin, H, W), jnp.float32)
    mod = Shortcut(Cin, Cin, subsample=1)
    out = mod(a, b)
    jax.block_until_ready(out)
    check(out, a + b, tol=1e-6)

    # Case 4: stride 2 with uneven spatial dims -> pre-sliced fallback path.
    x = jax.random.normal(keys[6], (1, Cin, 15, 18), jnp.float32)
    y = jax.random.normal(keys[7], (1, Cout, 8, 9), jnp.float32)
    mod = Shortcut(Cin, Cout, subsample=2)
    out = mod(x, y)
    jax.block_until_ready(out)
    check(out, _reference(mod, x, y))

    # Cases 5/6: shrink the tile budget so that even small arrays hit
    # multi-step grids with ragged edge blocks (the no-pad path that large,
    # non-128-aligned spatial sizes take in production).
    _set_budget_override(dict(stream=64 << 10, vmem_limit=32 << 20,
                              max_lane=256, min_steps=4, input_buffers=2))
    try:
        x = jax.random.normal(keys[8], (1, Cin, 24, 36), jnp.float32)
        y = jax.random.normal(keys[9], (1, Cout, 24, 36), jnp.float32)
        mod = Shortcut(Cin, Cout, subsample=1)
        out = mod(x, y)
        jax.block_until_ready(out)
        check(out, _reference(mod, x, y))

        a = jax.random.normal(keys[10], (1, 12, 24, 36), jnp.float32)
        b = jax.random.normal(keys[11], (1, 12, 24, 36), jnp.float32)
        mod = Shortcut(12, 12, subsample=1)
        out = mod(a, b)
        jax.block_until_ready(out)
        check(out, a + b, tol=1e-6)
    finally:
        _set_budget_override(None)

    print("KERNEL_OK")
</pallas_src>

<mosaic_0001>
module attributes {stable_mosaic.version = 11 : i64} {
  func.func @_conv_strided_kernel(%arg0: i32, %arg1: i32, %arg2: memref<8x4xf32, #tpu.memory_space<vmem>>, %arg3: memref<8x1xf32, #tpu.memory_space<vmem>>, %arg4: memref<1x4x16x16xf32, #tpu.memory_space<vmem>>, %arg5: memref<1x8x64xf32, #tpu.memory_space<vmem>>, %arg6: memref<1x8x64xf32, #tpu.memory_space<vmem>>) attributes {dimension_semantics = [#tpu.dimension_semantics<parallel>, #tpu.dimension_semantics<parallel>], iteration_bounds = array<i64: 2, 1>, scalar_prefetch = 0 : i64, scratch_operands = 0 : i64, tpu.core_type = #tpu.core_type<tc>, window_params = [{pipeline_mode = #tpu.pipeline_mode<synchronous>, transform_indices = @transform_0, window_bounds = array<i64: 8, 4>}, {pipeline_mode = #tpu.pipeline_mode<synchronous>, transform_indices = @transform_1, window_bounds = array<i64: 8, 1>}, {transform_indices = @transform_2, window_bounds = array<i64: 1, 4, 16, 16>}, {transform_indices = @transform_3, window_bounds = array<i64: 1, 8, 64>}, {transform_indices = @transform_4, window_bounds = array<i64: 1, 8, 64>}]} {
    %c0 = arith.constant 0 : index
    %c0_0 = arith.constant 0 : index
    %c0_1 = arith.constant 0 : index
    %c0_2 = arith.constant 0 : index
    %0 = vector.load %arg4[%c0, %c0_0, %c0_1, %c0_2] : memref<1x4x16x16xf32, #tpu.memory_space<vmem>>, vector<1x4x16x16xf32>
    %1 = vector.shape_cast %0 : vector<1x4x16x16xf32> to vector<4x16x16xf32>
    %2 = vector.shape_cast %1 : vector<4x16x16xf32> to vector<4x8x2x8x2xf32>
    %3 = vector.extract_strided_slice %2 {offsets = [0, 0, 0, 0, 0], sizes = [4, 8, 1, 8, 1], strides = [1, 1, 1, 1, 1]} : vector<4x8x2x8x2xf32> to vector<4x8x1x8x1xf32>
    %4 = vector.shape_cast %3 : vector<4x8x1x8x1xf32> to vector<4x8x8xf32>
    %5 = vector.shape_cast %4 : vector<4x8x8xf32> to vector<4x64xf32>
    %c0_3 = arith.constant 0 : index
    %c0_4 = arith.constant 0 : index
    %6 = vector.load %arg2[%c0_3, %c0_4] : memref<8x4xf32, #tpu.memory_space<vmem>>, vector<8x4xf32>
    %cst = arith.constant dense<0.000000e+00> : vector<8x64xf32>
    %7 = tpu.matmul %6, %5, %cst {dimension_numbers = #tpu.dot_dimension_numbers<[1], [0], [0], [1], [0, 0, 1, 1], [], []>} : vector<8x4xf32>, vector<4x64xf32>, vector<8x64xf32> -> vector<8x64xf32>
    %c0_5 = arith.constant 0 : index
    %c0_6 = arith.constant 0 : index
    %8 = vector.load %arg3[%c0_5, %c0_6] : memref<8x1xf32, #tpu.memory_space<vmem>>, vector<8x1xf32>
    %9 = vector.broadcast %8 : vector<8x1xf32> to vector<8x64xf32>
    %10 = arith.addf %7, %9 : vector<8x64xf32>
    %c0_7 = arith.constant 0 : index
    %c0_8 = arith.constant 0 : index
    %c0_9 = arith.constant 0 : index
    %11 = vector.load %arg5[%c0_7, %c0_8, %c0_9] : memref<1x8x64xf32, #tpu.memory_space<vmem>>, vector<1x8x64xf32>
    %12 = vector.shape_cast %11 : vector<1x8x64xf32> to vector<8x64xf32>
    %13 = arith.addf %10, %12 : vector<8x64xf32>
    %c0_10 = arith.constant 0 : index
    %c0_11 = arith.constant 0 : index
    %c0_12 = arith.constant 0 : index
    %14 = vector.load %arg6[%c0_10, %c0_11, %c0_12] : memref<1x8x64xf32, #tpu.memory_space<vmem>>, vector<1x8x64xf32>
    %15 = vector.shape_cast %14 : vector<1x8x64xf32> to vector<8x64xf32>
    %16 = vector.shape_cast %13 : vector<8x64xf32> to vector<1x8x64xf32>
    tpu.vector_store %arg6[%c0_10, %c0_11, %c0_12], %16 {strides = array<i32>} : memref<1x8x64xf32, #tpu.memory_space<vmem>>, vector<1x8x64xf32>,
    return
  }
  func.func @transform_0(%arg0: i32, %arg1: i32) -> (i32, i32) {
    %c0_i32 = arith.constant 0 : i32
    %c0_i32_0 = arith.constant 0 : i32
    %c0_i32_1 = arith.constant 0 : i32
    return %c0_i32, %c0_i32_0 : i32, i32
  }
  func.func @transform_1(%arg0: i32, %arg1: i32) -> (i32, i32) {
    %c0_i32 = arith.constant 0 : i32
    %c0_i32_0 = arith.constant 0 : i32
    %c0_i32_1 = arith.constant 0 : i32
    return %c0_i32, %c0_i32_0 : i32, i32
  }
  func.func @transform_2(%arg0: i32, %arg1: i32) -> (i32, i32, i32, i32) {
    %c0_i32 = arith.constant 0 : i32
    %c0_i32_0 = arith.constant 0 : i32
    %c0_i32_1 = arith.constant 0 : i32
    return %arg0, %c0_i32, %arg1, %c0_i32_0 : i32, i32, i32, i32
  }
  func.func @transform_3(%arg0: i32, %arg1: i32) -> (i32, i32, i32) {
    %c0_i32 = arith.constant 0 : i32
    %c0_i32_0 = arith.constant 0 : i32
    return %arg0, %c0_i32, %arg1 : i32, i32, i32
  }
  func.func @transform_4(%arg0: i32, %arg1: i32) -> (i32, i32, i32) {
    %c0_i32 = arith.constant 0 : i32
    %c0_i32_0 = arith.constant 0 : i32
    return %arg0, %c0_i32, %arg1 : i32, i32, i32
  }
}

module attributes {stable_mosaic.version = 11 : i64} {
  func.func @_conv_flat_kernel(%arg0: i32, %arg1: i32, %arg2: memref<8x4xf32, #tpu.memory_space<vmem>>, %arg3: memref<8x1xf32, #tpu.memory_space<vmem>>, %arg4: memref<1x4x64xf32, #tpu.memory_space<vmem>>, %arg5: memref<1x8x64xf32, #tpu.memory_space<vmem>>, %arg6: memref<1x8x64xf32, #tpu.memory_space<vmem>>) attributes {dimension_semantics = [#tpu.dimension_semantics<parallel>, #tpu.dimension_semantics<parallel>], iteration_bounds = array<i64: 2, 1>, scalar_prefetch = 0 : i64, scratch_operands = 0 : i64, tpu.core_type = #tpu.core_type<tc>, window_params = [{pipeline_mode = #tpu.pipeline_mode<synchronous>, transform_indices = @transform_0, window_bounds = array<i64: 8, 4>}, {pipeline_mode = #tpu.pipeline_mode<synchronous>, transform_indices = @transform_1, window_bounds = array<i64: 8, 1>}, {transform_indices = @transform_2, window_bounds = array<i64: 1, 4, 64>}, {transform_indices = @transform_3, window_bounds = array<i64: 1, 8, 64>}, {transform_indices = @transform_4, window_bounds = array<i64: 1, 8, 64>}]} {
    %c0 = arith.constant 0 : index
    %c0_0 = arith.constant 0 : index
    %0 = vector.load %arg2[%c0, %c0_0] : memref<8x4xf32, #tpu.memory_space<vmem>>, vector<8x4xf32>
    %c0_1 = arith.constant 0 : index
    %c0_2 = arith.constant 0 : index
    %c0_3 = arith.constant 0 : index
    %1 = vector.load %arg4[%c0_1, %c0_2, %c0_3] : memref<1x4x64xf32, #tpu.memory_space<vmem>>, vector<1x4x64xf32>
    %2 = vector.shape_cast %1 : vector<1x4x64xf32> to vector<4x64xf32>
    %cst = arith.constant dense<0.000000e+00> : vector<8x64xf32>
    %3 = tpu.matmul %0, %2, %cst {dimension_numbers = #tpu.dot_dimension_numbers<[1], [0], [0], [1], [0, 0, 1, 1], [], []>} : vector<8x4xf32>, vector<4x64xf32>, vector<8x64xf32> -> vector<8x64xf32>
    %c0_4 = arith.constant 0 : index
    %c0_5 = arith.constant 0 : index
    %4 = vector.load %arg3[%c0_4, %c0_5] : memref<8x1xf32, #tpu.memory_space<vmem>>, vector<8x1xf32>
    %5 = vector.broadcast %4 : vector<8x1xf32> to vector<8x64xf32>
    %6 = arith.addf %3, %5 : vector<8x64xf32>
    %c0_6 = arith.constant 0 : index
    %c0_7 = arith.constant 0 : index
    %c0_8 = arith.constant 0 : index
    %7 = vector.load %arg5[%c0_6, %c0_7, %c0_8] : memref<1x8x64xf32, #tpu.memory_space<vmem>>, vector<1x8x64xf32>
    %8 = vector.shape_cast %7 : vector<1x8x64xf32> to vector<8x64xf32>
    %9 = arith.addf %6, %8 : vector<8x64xf32>
    %c0_9 = arith.constant 0 : index
    %c0_10 = arith.constant 0 : index
    %c0_11 = arith.constant 0 : index
    %10 = vector.load %arg6[%c0_9, %c0_10, %c0_11] : memref<1x8x64xf32, #tpu.memory_space<vmem>>, vector<1x8x64xf32>
    %11 = vector.shape_cast %10 : vector<1x8x64xf32> to vector<8x64xf32>
    %12 = vector.shape_cast %9 : vector<8x64xf32> to vector<1x8x64xf32>
    tpu.vector_store %arg6[%c0_9, %c0_10, %c0_11], %12 {strides = array<i32>} : memref<1x8x64xf32, #tpu.memory_space<vmem>>, vector<1x8x64xf32>,
    return
  }
  func.func @transform_0(%arg0: i32, %arg1: i32) -> (i32, i32) {
    %c0_i32 = arith.constant 0 : i32
    %c0_i32_0 = arith.constant 0 : i32
    %c0_i32_1 = arith.constant 0 : i32
    return %c0_i32, %c0_i32_0 : i32, i32
  }
  func.func @transform_1(%arg0: i32, %arg1: i32) -> (i32, i32) {
    %c0_i32 = arith.constant 0 : i32
    %c0_i32_0 = arith.constant 0 : i32
    %c0_i32_1 = arith.constant 0 : i32
    return %c0_i32, %c0_i32_0 : i32, i32
  }
  func.func @transform_2(%arg0: i32, %arg1: i32) -> (i32, i32, i32) {
    %c0_i32 = arith.constant 0 : i32
    %c0_i32_0 = arith.constant 0 : i32
    return %arg0, %c0_i32, %arg1 : i32, i32, i32
  }
  func.func @transform_3(%arg0: i32, %arg1: i32) -> (i32, i32, i32) {
    %c0_i32 = arith.constant 0 : i32
    %c0_i32_0 = arith.constant 0 : i32
    return %arg0, %c0_i32, %arg1 : i32, i32, i32
  }
  func.func @transform_4(%arg0: i32, %arg1: i32) -> (i32, i32, i32) {
    %c0_i32 = arith.constant 0 : i32
    %c0_i32_0 = arith.constant 0 : i32
    return %arg0, %c0_i32, %arg1 : i32, i32, i32
  }
}

</mosaic_0001>

<bundles_post_ra>
// kernel: _conv1x1_add_fused.1
= control target key start
LH: loop header
LB: loop body
LE: loop exit
PB: predicated region body
PF: predicated region fallthrough
CT: control target
= control target key end

     0   :  { %s2106_s15 = smov 0   ;;  %s2108_s16 = smov 0   ;;  %s2792_s0 = inlined_call_operand.vmem [shape: f32[8,4], index: 0, kind: input, shape index: {}]   ;;  %s2793_s1 = inlined_call_operand.vmem [shape: f32[8,1], index: 1, kind: input, shape index: {}]   ;;  %s2794_s2 = inlined_call_operand.vmem [shape: f32[2,4,16,16], index: 2, kind: input, shape index: {}]   ;;  %s2795_s3 = inlined_call_operand.vmem [shape: f32[2,8,64], index: 3, kind: input, shape index: {}]   ;;  %s2796_s4 = inlined_call_operand.vmem [shape: f32[2,8,64], index: 4, kind: output, shape index: {}]  }
   0x1   :  { %s2110_s17 = smov 0  }
   0x2 LB: > { %s26_s18 = sadd.s32 1, %s2063_s16  ;;  %p1990_p0 = scmp.ge.s32.totalorder %s2067_s17, 1  ;;  %s2067_s17 = sphi %s2110_s17, %s14_s17   ;;  %s2063_s16 = sphi %s2108_s16, %s2798_s16   ;;  %s2059_s15 = sphi %s2106_s15, %s2797_s15  }
   0x3   : > { %p28_p1 = scmp.ge.s32.totalorder %s26_s18, 2  ;;  %p197_p2 = scmp.lt.s32.totalorder %s2067_s17, 3 }
   0x5   : > { %s2800_s18 = smov (%p28_p1, %s26_s18), 0  ;;  %p198_p3 = pnand %p1990_p0, %p197_p2 }
   0x6   : > { %p237_p4 = scmp.lt.s32.totalorder (!%p198_p3), %s2059_s15, 1  ;;  %s2069_s23 = smov (!%p198_p3), 124   ;;  %v2075_v2 = vmov (!%p198_p3), 0   ;;  %v2077_v17 = vmov (!%p198_p3), 1983009808   ;;  %v449_v19 = vlaneseq (!%p198_p3)  ;;  %vm2080_vm0 = vmmov (!%p198_p3), 0  }
   0x7   : > { %201 = sbr.rel (%p198_p3) target bundleno = 614 (0x266), region = 36  ;;  %s2070_s24 = smov (!%p198_p3), 126   ;;  %2044 = vset.pattern.permute.xlu1 (!%p198_p3), %v2075_v2  ;;  %2043 = vset.pattern.permute.xlu0 (!%p198_p3), %v2075_v2  ;;  %v447_v18 = vunpack.c.l.s4 (!%p198_p3), %v2077_v17  ;;  %v2078_v20 = vmov (!%p198_p3), 1934713408   ;;  %vm1646_vm1 = vcmask (!%p198_p3), 130112   ;;  %vm1653_vm2 = vcmask (!%p198_p3), 195712  }
   0x8   : > { %s2071_s25 = smov (!%p198_p3), 122   ;;  %s2072_s26 = smov (!%p198_p3), 120   ;;  %v511_v21 = vunpack.c.l.s4 (!%p198_p3), %v2078_v20  ;;  %v2273_v25 = vshrl.u32 (!%p198_p3), %v449_v19, 7  ;;  %vm1660_vm3 = vcmask (!%p198_p3), 261312   ;;  %vm1667_vm4 = vcmask (!%p198_p3), 326912  }
   0x9   : > { %s2073_s27 = smov (!%p198_p3), 118   ;;  %s2074_s28 = smov (!%p198_p3), 116   ;;  %v448_v24 = vunpack.c.0.s8 (!%p198_p3), %v447_v18  ;;  %vm1674_vm5 = vcmask (!%p198_p3), 392512   ;;  %vm1681_vm6 = vcmask (!%p198_p3), 458112   ;;  %vm1688_vm7 = vcmask (!%p198_p3), 523712  }
   0xa   : > { %s2076_s29 = smov (!%p198_p3), 114   ;;  %v512_v26 = vunpack.c.0.s8 (!%p198_p3), %v511_v21  ;;  %vm1807_vm8 = vcmask (!%p198_p3), 1041409   ;;  %vm1809_vm9 = vcmask (!%p198_p3), 1042434   ;;  %vm1811_vm10 = vcmask (!%p198_p3), 1043459  }
   0xb   : > { %v2276_v30 = vsub.s32 (!%p198_p3), %v448_v24, %v2273_v25  ;;  %vm1817_vm11 = vcmask (!%p198_p3), 1043456   ;;  %vm1813_vm12 = vcmask (!%p198_p3), 31744   ;;  %vm1892_vm13 = vcmask (!%p198_p3), 523264  }
   0xc   : > { %v2285_v36 = vsub.s32 (!%p198_p3), %v512_v26, %v2273_v25 }
   0xe   : > { %s2802_s15 = smov (!%p237_p4, %s2059_s15), 1 }
   0xf   : > { %s1999_s19 = sshll.u32 %s2802_s15, 6  ;;  %s1993_s8 = sshll.u32 %s2802_s15, 3 }
  0x10   : > { %s2130_s22 = scalar_lea.vmem %s2794_s2, %s1999_s19  ;;  %s252_s11 = scalar_lea.vmem %s2795_s3, %s1993_s8 }
  0x11   : > { %v2133_v0 = vld [vmem:[%s2130_s22] sm:$0xff]  ;;  %v2140_v1 = vld [vmem:[%s2130_s22 + $0x10] sm:$0xff]  ;;  %v2201_v5 = vld [vmem:[%s2130_s22 + $0x18] sm:$0xff]  ;;  %s259_s14 = scalar_lea.vmem %s2796_s4, %s1993_s8 }
  0x12   : > { %300 = vrot.lane.b32.xlu1 %v2133_v0, %s2069_s23  ;;  %276 = vrot.lane.b32.xlu0 %v2133_v0, %s2070_s24  ;;  %v2167_v3 = vld [vmem:[%s2130_s22 + $0x20] sm:$0xff]  ;;  %v2182_v4 = vld [vmem:[%s2130_s22 + $0x30] sm:$0xff] }
  0x13   : > { %v2204_v6 = vld [vmem:[%s2130_s22 + $0x8] sm:$0xff]  ;;  %v2250_v8 = vld [vmem:[%s2130_s22 + $0x38] sm:$0xff] }
  0x14   : > { %v2235_v7 = vld [vmem:[%s2130_s22 + $0x28] sm:$0xff] }
  0x16   : > { %304 = vrot.lane.b32.xlu1 %v2140_v1, %s2069_s23  ;;  %280 = vrot.lane.b32.xlu0 %v2140_v1, %s2070_s24 }
  0x1a   : > { %328 = vrot.lane.b32.xlu1 %v2140_v1, %s2071_s25  ;;  %324 = vrot.lane.b32.xlu0 %v2133_v0, %s2071_s25 }
  0x1e   : > { %352 = vrot.lane.b32.xlu1 %v2140_v1, %s2072_s26  ;;  %348 = vrot.lane.b32.xlu0 %v2133_v0, %s2072_s26 }
  0x22   : > { %376 = vrot.lane.b32.xlu1 %v2140_v1, %s2073_s27  ;;  %372 = vrot.lane.b32.xlu0 %v2133_v0, %s2073_s27 }
  0x26   : > { %400 = vrot.lane.b32.xlu1 %v2140_v1, %s2074_s28  ;;  %396 = vrot.lane.b32.xlu0 %v2133_v0, %s2074_s28 }
  0x2a   : > { %424 = vrot.lane.b32.xlu1 %v2140_v1, %s2076_s29  ;;  %420 = vrot.lane.b32.xlu0 %v2133_v0, %s2076_s29 }
  0x2e   : > { %308 = vrot.lane.b32.xlu1 %v2167_v3, %s2069_s23  ;;  %284 = vrot.lane.b32.xlu0 %v2167_v3, %s2070_s24 }
  0x32   : > { %356 = vrot.lane.b32.xlu1 %v2167_v3, %s2072_s26  ;;  %332 = vrot.lane.b32.xlu0 %v2167_v3, %s2071_s25 }
  0x36   : > { %404 = vrot.lane.b32.xlu1 %v2167_v3, %s2074_s28  ;;  %380 = vrot.lane.b32.xlu0 %v2167_v3, %s2073_s27 }
  0x3a   : > { %288 = vrot.lane.b32.xlu1 %v2182_v4, %s2070_s24  ;;  %428 = vrot.lane.b32.xlu0 %v2167_v3, %s2076_s29 }
  0x3e   : > { %336 = vrot.lane.b32.xlu1 %v2182_v4, %s2071_s25  ;;  %312 = vrot.lane.b32.xlu0 %v2182_v4, %s2069_s23 }
  0x42   : > { %384 = vrot.lane.b32.xlu1 %v2182_v4, %s2073_s27  ;;  %360 = vrot.lane.b32.xlu0 %v2182_v4, %s2072_s26 }
  0x46   : > { %432 = vrot.lane.b32.xlu1 %v2182_v4, %s2076_s29  ;;  %408 = vrot.lane.b32.xlu0 %v2182_v4, %s2074_s28 }
  0x4a   : > { %282 = vrot.lane.b32.xlu1 %v2201_v5, %s2070_s24  ;;  %278 = vrot.lane.b32.xlu0 %v2204_v6, %s2070_s24 }
  0x4e   : > { %306 = vrot.lane.b32.xlu1 %v2201_v5, %s2069_s23  ;;  %302 = vrot.lane.b32.xlu0 %v2204_v6, %s2069_s23 }
  0x52   : > { %330 = vrot.lane.b32.xlu1 %v2201_v5, %s2071_s25  ;;  %326 = vrot.lane.b32.xlu0 %v2204_v6, %s2071_s25 }
  0x56   : > { %354 = vrot.lane.b32.xlu1 %v2201_v5, %s2072_s26  ;;  %350 = vrot.lane.b32.xlu0 %v2204_v6, %s2072_s26 }
  0x5a   : > { %378 = vrot.lane.b32.xlu1 %v2201_v5, %s2073_s27  ;;  %374 = vrot.lane.b32.xlu0 %v2204_v6, %s2073_s27 }
  0x5e   : > { %402 = vrot.lane.b32.xlu1 %v2201_v5, %s2074_s28  ;;  %398 = vrot.lane.b32.xlu0 %v2204_v6, %s2074_s28 }
  0x62   : > { %426 = vrot.lane.b32.xlu1 %v2201_v5, %s2076_s29  ;;  %422 = vrot.lane.b32.xlu0 %v2204_v6, %s2076_s29 }
  0x66   : > { %310 = vrot.lane.b32.xlu1 %v2235_v7, %s2069_s23  ;;  %286 = vrot.lane.b32.xlu0 %v2235_v7, %s2070_s24 }
  0x6a   : > { %358 = vrot.lane.b32.xlu1 %v2235_v7, %s2072_s26  ;;  %334 = vrot.lane.b32.xlu0 %v2235_v7, %s2071_s25 }
  0x6e   : > { %406 = vrot.lane.b32.xlu1 %v2235_v7, %s2074_s28  ;;  %382 = vrot.lane.b32.xlu0 %v2235_v7, %s2073_s27 }
  0x72   : > { %290 = vrot.lane.b32.xlu1 %v2250_v8, %s2070_s24  ;;  %430 = vrot.lane.b32.xlu0 %v2235_v7, %s2076_s29 }
  0x76   : > { %338 = vrot.lane.b32.xlu1 %v2250_v8, %s2071_s25  ;;  %314 = vrot.lane.b32.xlu0 %v2250_v8, %s2069_s23 }
  0x7a   : > { %386 = vrot.lane.b32.xlu1 %v2250_v8, %s2073_s27  ;;  %362 = vrot.lane.b32.xlu0 %v2250_v8, %s2072_s26 }
  0x7e   : > { %434 = vrot.lane.b32.xlu1 %v2250_v8, %s2076_s29  ;;  %410 = vrot.lane.b32.xlu0 %v2250_v8, %s2074_s28 }
  0x84   : > { %v2268_v9 = vpop.permute.xlu1 %300  ;;  %v277_v10 = vpop.permute.xlu0 %276 }
  0x85   : > { %v444_v31 = vcombine.low %v2133_v0, %v2268_v9  ;;  %v445_v34 = vcombine.high %v2133_v0, %v2268_v9 }
  0x87   : > { %v452_v47 = vrot.slane %v444_v31, %v2276_v30 }
  0x88   : > { %v2270_v11 = vpop.permute.xlu1 %304  ;;  %v281_v12 = vpop.permute.xlu0 %280 }
  0x89   : > { %v708_v32 = vcombine.low %v2140_v1, %v2270_v11  ;;  %v709_v48 = vcombine.high %v2140_v1, %v2270_v11 }
  0x8b   : > { %v716_v49 = vrot.slane %v708_v32, %v2276_v30 }
  0x8c   : > { %v329_v13 = vpop.permute.xlu1 %328  ;;  %v325_v14 = vpop.permute.xlu0 %324 }
  0x8d   : > { %v460_v27 = vcombine.low %v277_v10, %v325_v14  ;;  %v724_v33 = vcombine.low %v281_v12, %v329_v13  ;;  %v725_v35 = vcombine.high %v281_v12, %v329_v13  ;;  %v461_v37 = vcombine.high %v277_v10, %v325_v14 }
  0x8f   : > { %v468_v38 = vrot.slane %v460_v27, %v2276_v30  ;;  %v732_v50 = vrot.slane %v724_v33, %v2276_v30  ;;  %v2302_v61 = vrot.slane %v725_v35, %v2276_v30  ;;  %v2305_v62 = vrot.slane %v461_v37, %v2276_v30 }
  0x90   : > { %v353_v15 = vpop.permute.xlu1 %352  ;;  %v349_v16 = vpop.permute.xlu0 %348 }
  0x91   : > { %v508_v55 = vcombine.low %v452_v47, %v468_v38  ;;  %v509_v56 = vcombine.high %v452_v47, %v468_v38  ;;  %v772_v11 = vcombine.low %v716_v49, %v732_v50  ;;  %v773_v12 = vcombine.high %v716_v49, %v732_v50 }
  0x93   : > { %v523_v17 = vrot.slane %v509_v56, %v2285_v36  ;;  %v516_v20 = vrot.slane %v508_v55, %v2285_v36  ;;  %v780_v38 = vrot.slane %v772_v11, %v2285_v36 }
  0x94   : > { %v377_v22 = vpop.permute.xlu1 %376  ;;  %v373_v23 = vpop.permute.xlu0 %372 }
  0x98   : > { %v401_v28 = vpop.permute.xlu1 %400  ;;  %v397_v29 = vpop.permute.xlu0 %396 }
  0x99   : > { %v740_v39 = vcombine.low %v353_v15, %v401_v28  ;;  %v476_v40 = vcombine.low %v349_v16, %v397_v29  ;;  %v741_v51 = vcombine.high %v353_v15, %v401_v28  ;;  %v477_v52 = vcombine.high %v349_v16, %v397_v29 }
  0x9b   : > { %v748_v57 = vrot.slane %v740_v39, %v2276_v30  ;;  %v484_v58 = vrot.slane %v476_v40, %v2276_v30  ;;  %v2314_v13 = vrot.slane %v741_v51, %v2276_v30  ;;  %v2317_v14 = vrot.slane %v477_v52, %v2276_v30 }
  0x9c   : > { %v425_v41 = vpop.permute.xlu1 %424  ;;  %v421_v42 = vpop.permute.xlu0 %420  ;;  %v787_v39 = vrot.slane %v773_v12, %v2285_v36 }
  0x9d   : > { %v756_v43 = vcombine.low %v377_v22, %v425_v41  ;;  %v757_v44 = vcombine.high %v377_v22, %v425_v41  ;;  %v492_v45 = vcombine.low %v373_v23, %v421_v42  ;;  %v493_v46 = vcombine.high %v373_v23, %v421_v42 }
  0x9e   : > { %v2328_v22 = vrot.slane %v445_v34, %v2276_v30  ;;  %v2331_v23 = vrot.slane %v709_v48, %v2276_v30 }
  0x9f   : > { %v764_v53 = vrot.slane %v756_v43, %v2276_v30  ;;  %v500_v54 = vrot.slane %v492_v45, %v2276_v30  ;;  %v2308_v63 = vrot.slane %v757_v44, %v2276_v30  ;;  %v2311_v0 = vrot.slane %v493_v46, %v2276_v30 }
  0xa0   : > { %v2297_v59 = vpop.permute.xlu1 %308  ;;  %v2299_v60 = vpop.permute.xlu0 %284  ;;  %v788_v32 = vcombine.low %v2331_v23, %v2302_v61  ;;  %v524_v34 = vcombine.low %v2328_v22, %v2305_v62  ;;  %v789_v12 = vcombine.high %v2331_v23, %v2302_v61 }
  0xa1   : > { %v804_v1 = vcombine.low %v748_v57, %v764_v53  ;;  %v805_v2 = vcombine.high %v748_v57, %v764_v53  ;;  %v540_v9 = vcombine.low %v484_v58, %v500_v54  ;;  %v541_v10 = vcombine.high %v484_v58, %v500_v54 }
  0xa2   : > { %v820_v24 = vcombine.low %v2314_v13, %v2308_v63  ;;  %v556_v26 = vcombine.low %v2317_v14, %v2311_v0  ;;  %v972_v40 = vcombine.low %v2167_v3, %v2297_v59  ;;  %v532_v49 = vrot.slane %v524_v34, %v2285_v36 }
  0xa3   : > { %v555_v18 = vrot.slane %v541_v10, %v2285_v36  ;;  %v548_v21 = vrot.slane %v540_v9, %v2285_v36  ;;  %v812_v29 = vrot.slane %v804_v1, %v2285_v36  ;;  %v819_v31 = vrot.slane %v805_v2, %v2285_v36 }
  0xa4   : > { %v2319_v15 = vpop.permute.xlu1 %356  ;;  %v2321_v16 = vpop.permute.xlu0 %332  ;;  %v564_v43 = vrot.slane %v556_v26, %v2285_v36  ;;  %v828_v44 = vrot.slane %v820_v24, %v2285_v36  ;;  %v796_v50 = vrot.slane %v788_v32, %v2285_v36  ;;  %v980_v51 = vrot.slane %v972_v40, %v2276_v30 }
  0xa5   : > { %v573_v27 = vcombine.low %v523_v17, %v555_v18  ;;  %v572_v28 = vcombine.low %v516_v20, %v548_v21  ;;  %v988_v33 = vcombine.low %v2299_v60, %v2321_v16  ;;  %v836_v41 = vcombine.low %v780_v38, %v812_v29 }
  0xa6   : > { %v837_v42 = vcombine.low %v787_v39, %v819_v31  ;;  %v574_v54 = vcombine.low %v532_v49, %v564_v43  ;;  %v838_v55 = vcombine.low %v796_v50, %v828_v44  ;;  %v989_v2 = vcombine.high %v2299_v60, %v2321_v16 }
  0xa7   : > { %1543 = vperm.xlu1 %2044, %v573_v27   ;;  %1540 = vperm.xlu0 %2043, %v572_v28   ;;  %v996_v45 = vrot.slane %v988_v33, %v2276_v30  ;;  %v821_v17 = vcombine.high %v2314_v13, %v2308_v63  ;;  %v525_v21 = vcombine.high %v2328_v22, %v2305_v62 }
  0xa8   : > { %v405_v35 = vpop.permute.xlu1 %404  ;;  %v381_v37 = vpop.permute.xlu0 %380  ;;  %v557_v60 = vcombine.high %v2317_v14, %v2311_v0  ;;  %v2385_v23 = vrot.slane %v989_v2, %v2276_v30  ;;  %v803_v32 = vrot.slane %v789_v12, %v2285_v36 }
  0xa9   : > { %v1004_v46 = vcombine.low %v2319_v15, %v405_v35  ;;  %v1036_v56 = vcombine.low %v980_v51, %v996_v45  ;;  %v1037_v57 = vcombine.high %v980_v51, %v996_v45  ;;  %v1005_v9 = vcombine.high %v2319_v15, %v405_v35 }
  0xaa   : > { %v973_v15 = vcombine.high %v2167_v3, %v2297_v59  ;;  %v835_v27 = vrot.slane %v821_v17, %v2285_v36  ;;  %v571_v31 = vrot.slane %v557_v60, %v2285_v36  ;;  %v539_v39 = vrot.slane %v525_v21, %v2285_v36 }
  0xab   : > { %1564 = vperm.xlu1 %2044, %v836_v41   ;;  %1567 = vperm.xlu0 %2043, %v837_v42   ;;  %v1012_v58 = vrot.slane %v1004_v46, %v2276_v30  ;;  %v1051_v24 = vrot.slane %v1037_v57, %v2285_v36  ;;  %v1044_v63 = vrot.slane %v1036_v56, %v2285_v36 }
  0xac   : > { %v2353_v47 = vpop.permute.xlu1 %288  ;;  %v429_v48 = vpop.permute.xlu0 %428  ;;  %v2388_v62 = vrot.slane %v1005_v9, %v2276_v30  ;;  %v2400_v28 = vrot.slane %v973_v15, %v2276_v30  ;;  %v839_v42 = vcombine.low %v803_v32, %v835_v27  ;;  %v575_v43 = vcombine.low %v539_v39, %v571_v31 }
  0xad   : > { %v1020_v52 = vcombine.low %v381_v37, %v429_v48  ;;  %v1021_v53 = vcombine.high %v381_v37, %v429_v48 }
  0xae   : > { %v1052_v33 = vcombine.low %v2400_v28, %v2385_v23 }
  0xaf   : > { %v1028_v1 = vrot.slane %v1020_v52, %v2276_v30  ;;  %1546 = vperm.xlu1 %2044, %v574_v54   ;;  %1570 = vperm.xlu0 %2043, %v838_v55   ;;  %v2378_v16 = vrot.slane %v1021_v53, %v2276_v30 }
  0xb0   : > { %v2363_v10 = vpop.permute.xlu1 %336  ;;  %v2365_v11 = vpop.permute.xlu0 %312  ;;  %v1060_v52 = vrot.slane %v1052_v33, %v2285_v36 }
  0xb1   : > { %v1068_v18 = vcombine.low %v1012_v58, %v1028_v1  ;;  %v1069_v20 = vcombine.high %v1012_v58, %v1028_v1  ;;  %v1252_v3 = vcombine.low %v2353_v47, %v2363_v10  ;;  %v1236_v59 = vcombine.low %v2182_v4, %v2365_v11 }
  0xb2   : > { %v1084_v29 = vcombine.low %v2388_v62, %v2378_v16 }
  0xb3   : > { %v1083_v61 = vrot.slane %v1069_v20, %v2285_v36  ;;  %v1076_v13 = vrot.slane %v1068_v18, %v2285_v36  ;;  %v1260_v34 = vrot.slane %v1252_v3, %v2276_v30  ;;  %v1244_v35 = vrot.slane %v1236_v59, %v2276_v30 }
  0xb4   : > { %v2394_v0 = vpop.permute.xlu1 %384  ;;  %v2396_v14 = vpop.permute.xlu0 %360  ;;  %v1092_v44 = vrot.slane %v1084_v29, %v2285_v36 }
  0xb5   : > { %v1101_v22 = vcombine.low %v1051_v24, %v1083_v61  ;;  %v1100_v26 = vcombine.low %v1044_v63, %v1076_v13  ;;  %v1300_v48 = vcombine.low %v1244_v35, %v1260_v34  ;;  %v1301_v49 = vcombine.high %v1244_v35, %v1260_v34 }
  0xb6   : > { %v1102_v55 = vcombine.low %v1060_v52, %v1092_v44  ;;  %v1253_v61 = vcombine.high %v2353_v47, %v2363_v10  ;;  %v1237_v63 = vcombine.high %v2182_v4, %v2365_v11  ;;  %v1085_v10 = vcombine.high %v2388_v62, %v2378_v16 }
  0xb7   : > { %1591 = vperm.xlu0 %2043, %v1101_v22   ;;  %1588 = vperm.xlu1 %2044, %v1100_v26   ;;  %v1315_v2 = vrot.slane %v1301_v49, %v2285_v36  ;;  %v1308_v9 = vrot.slane %v1300_v48, %v2285_v36 }
  0xb8   : > { %v433_v37 = vpop.permute.xlu1 %432  ;;  %v409_v38 = vpop.permute.xlu0 %408  ;;  %v2462_v11 = vrot.slane %v1253_v61, %v2276_v30  ;;  %v2467_v31 = vrot.slane %v1237_v63, %v2276_v30 }
  0xb9   : > { %v1284_v40 = vcombine.low %v2394_v0, %v433_v37  ;;  %v1268_v41 = vcombine.low %v2396_v14, %v409_v38  ;;  %v1285_v26 = vcombine.high %v2394_v0, %v433_v37  ;;  %v1269_v27 = vcombine.high %v2396_v14, %v409_v38 }
  0xba   : > { %v1053_v38 = vcombine.high %v2400_v28, %v2385_v23  ;;  %v1099_v23 = vrot.slane %v1085_v10, %v2285_v36  ;;  %v1316_v28 = vcombine.low %v2467_v31, %v2462_v11 }
  0xbb   : > { %v1292_v45 = vrot.slane %v1284_v40, %v2276_v30  ;;  %v1276_v46 = vrot.slane %v1268_v41, %v2276_v30  ;;  %1573 = vperm.xlu0 %2043, %v839_v42   ;;  %1549 = vperm.xlu1 %2044, %v575_v43   ;;  %v1299_v62 = vrot.slane %v1285_v26, %v2276_v30 }
  0xbc   : > { %v2416_v50 = vpop.permute.xlu1 %282  ;;  %v2418_v51 = vpop.permute.xlu0 %278  ;;  %v1283_v34 = vrot.slane %v1269_v27, %v2276_v30  ;;  %v1324_v26 = vrot.slane %v1316_v28, %v2285_v36 }
  0xbd   : > { %v1332_v53 = vcombine.low %v1276_v46, %v1292_v45  ;;  %v1333_v54 = vcombine.high %v1276_v46, %v1292_v45 }
  0xbe   : > { %v1348_v52 = vcombine.low %v1283_v34, %v1299_v62 }
  0xbf   : > { %v1347_v56 = vrot.slane %v1333_v54, %v2285_v36  ;;  %v1340_v57 = vrot.slane %v1332_v53, %v2285_v36  ;;  %1594 = vperm.xlu1 %2044, %v1102_v55   ;;  %v1067_v55 = vrot.slane %v1053_v38, %v2285_v36 }
  0xc0   : > { %v2423_v58 = vpop.permute.xlu1 %306  ;;  %v2425_v1 = vpop.permute.xlu0 %302  ;;  %v1356_v27 = vrot.slane %v1348_v52, %v2285_v36 }
  0xc1   : > { %v1365_v12 = vcombine.low %v1315_v2, %v1347_v56  ;;  %v1364_v17 = vcombine.low %v1308_v9, %v1340_v57  ;;  %v840_v47 = vcombine.low %v2201_v5, %v2423_v58  ;;  %v576_v4 = vcombine.low %v2204_v6, %v2425_v1 }
  0xc2   : > { %v1349_v56 = vcombine.high %v1283_v34, %v1299_v62  ;;  %v1103_v63 = vcombine.low %v1067_v55, %v1099_v23 }
  0xc3   : > { %1615 = vperm.xlu1 %2044, %v1365_v12   ;;  %1612 = vperm.xlu0 %2043, %v1364_v17   ;;  %v848_v39 = vrot.slane %v840_v47, %v2276_v30  ;;  %v584_v40 = vrot.slane %v576_v4, %v2276_v30 }
  0xc4   : > { %v2429_v18 = vpop.permute.xlu1 %330  ;;  %v2431_v20 = vpop.permute.xlu0 %326 }
  0xc5   : > { %v856_v13 = vcombine.low %v2416_v50, %v2429_v18  ;;  %v592_v3 = vcombine.low %v2418_v51, %v2431_v20  ;;  %v857_v62 = vcombine.high %v2416_v50, %v2429_v18  ;;  %v577_v50 = vcombine.high %v2204_v6, %v2425_v1 }
  0xc7   : > { %v2470_v0 = vrot.slane %v856_v13, %v2276_v30  ;;  %v2473_v14 = vrot.slane %v592_v3, %v2276_v30  ;;  %v1317_v13 = vcombine.high %v2467_v31, %v2462_v11  ;;  %v1363_v11 = vrot.slane %v1349_v56, %v2285_v36 }
  0xc8   : > { %v2433_v21 = vpop.permute.xlu1 %354  ;;  %v2435_v60 = vpop.permute.xlu0 %350  ;;  %v2544_v38 = vrot.slane %v857_v62, %v2276_v30 }
  0xc9   : > { %v904_v44 = vcombine.low %v848_v39, %v2470_v0  ;;  %v640_v45 = vcombine.low %v584_v40, %v2473_v14  ;;  %v641_v31 = vcombine.high %v584_v40, %v2473_v14  ;;  %v593_v14 = vcombine.high %v2418_v51, %v2431_v20 }
  0xcb   : > { %v912_v12 = vrot.slane %v904_v44, %v2285_v36  ;;  %v648_v17 = vrot.slane %v640_v45, %v2285_v36  ;;  %v655_v40 = vrot.slane %v641_v31, %v2285_v36 }
  0xcc   : > { %v2437_v15 = vpop.permute.xlu1 %378  ;;  %v2439_v24 = vpop.permute.xlu0 %374 }
  0xd0   : > { %v2449_v59 = vpop.permute.xlu1 %402  ;;  %v2451_v22 = vpop.permute.xlu0 %398 }
  0xd1   : > { %v872_v29 = vcombine.low %v2433_v21, %v2449_v59  ;;  %v608_v32 = vcombine.low %v2435_v60, %v2451_v22  ;;  %v609_v6 = vcombine.high %v2435_v60, %v2451_v22 }
  0xd3   : > { %v880_v41 = vrot.slane %v872_v29, %v2276_v30  ;;  %v616_v46 = vrot.slane %v608_v32, %v2276_v30  ;;  %v841_v32 = vcombine.high %v2201_v5, %v2423_v58  ;;  %v623_v23 = vrot.slane %v609_v6, %v2276_v30 }
  0xd4   : > { %v427_v33 = vpop.permute.xlu1 %426  ;;  %v2477_v16 = vpop.permute.xlu0 %422 }
  0xd5   : > { %v888_v35 = vcombine.low %v2437_v15, %v427_v33  ;;  %v624_v37 = vcombine.low %v2439_v24, %v2477_v16  ;;  %v889_v3 = vcombine.high %v2437_v15, %v427_v33  ;;  %v905_v15 = vcombine.high %v848_v39, %v2470_v0 }
  0xd6   : > { %v873_v33 = vcombine.high %v2433_v21, %v2449_v59  ;;  %v625_v58 = vcombine.high %v2439_v24, %v2477_v16  ;;  %v1366_v0 = vcombine.low %v1324_v26, %v1356_v27  ;;  %v2561_v60 = vrot.slane %v841_v32, %v2276_v30 }
  0xd7   : > { %v896_v42 = vrot.slane %v888_v35, %v2276_v30  ;;  %v632_v43 = vrot.slane %v624_v37, %v2276_v30  ;;  %v2539_v21 = vrot.slane %v889_v3, %v2276_v30  ;;  %v919_v39 = vrot.slane %v905_v15, %v2285_v36 }
  0xd8   : > { %v2494_v48 = vpop.permute.xlu1 %310  ;;  %v2496_v49 = vpop.permute.xlu0 %286  ;;  %v2554_v51 = vrot.slane %v873_v33, %v2276_v30  ;;  %v2564_v22 = vrot.slane %v625_v58, %v2276_v30  ;;  %v920_v55 = vcombine.low %v2561_v60, %v2544_v38 }
  0xd9   : > { %v936_v53 = vcombine.low %v880_v41, %v896_v42  ;;  %v672_v54 = vcombine.low %v616_v46, %v632_v43  ;;  %v937_v47 = vcombine.high %v880_v41, %v896_v42  ;;  %v673_v4 = vcombine.high %v616_v46, %v632_v43 }
  0xda   : > { %v1104_v18 = vcombine.low %v2235_v7, %v2494_v48  ;;  %v2569_v43 = vrot.slane %v593_v14, %v2276_v30  ;;  %v952_v44 = vcombine.low %v2554_v51, %v2539_v21  ;;  %v928_v62 = vrot.slane %v920_v55, %v2285_v36 }
  0xdb   : > { %v944_v57 = vrot.slane %v936_v53, %v2285_v36  ;;  %v680_v61 = vrot.slane %v672_v54, %v2285_v36  ;;  %v951_v59 = vrot.slane %v937_v47, %v2285_v36  ;;  %v687_v37 = vrot.slane %v673_v4, %v2285_v36 }
  0xdc   : > { %v2503_v2 = vpop.permute.xlu1 %358  ;;  %v2505_v9 = vpop.permute.xlu0 %334  ;;  %v1112_v41 = vrot.slane %v1104_v18, %v2276_v30  ;;  %v591_v54 = vrot.slane %v577_v50, %v2276_v30  ;;  %v960_v26 = vrot.slane %v952_v44, %v2285_v36  ;;  %v689_v14 = vcombine.high %v623_v23, %v2564_v22 }
  0xdd   : > { %v968_v10 = vcombine.low %v912_v12, %v944_v57  ;;  %v704_v29 = vcombine.low %v648_v17, %v680_v61  ;;  %v1120_v34 = vcombine.low %v2496_v49, %v2505_v9  ;;  %v969_v45 = vcombine.low %v919_v39, %v951_v59 }
  0xde   : > { %v705_v46 = vcombine.low %v655_v40, %v687_v37  ;;  %v1331_v12 = vrot.slane %v1317_v13, %v2285_v36  ;;  %v688_v17 = vcombine.low %v623_v23, %v2564_v22  ;;  %v1121_v31 = vcombine.high %v2496_v49, %v2505_v9 }
  0xdf   : > { %1576 = vperm.xlu1 %2044, %v968_v10   ;;  %1552 = vperm.xlu0 %2043, %v704_v29   ;;  %v2549_v1 = vrot.slane %v1120_v34, %v2276_v30  ;;  %v970_v50 = vcombine.low %v928_v62, %v960_v26  ;;  %v1105_v49 = vcombine.high %v2235_v7, %v2494_v48 }
  0xe0   : > { %v2526_v35 = vpop.permute.xlu1 %406  ;;  %v2528_v5 = vpop.permute.xlu0 %382  ;;  %v1367_v3 = vcombine.low %v1331_v12, %v1363_v11  ;;  %v696_v15 = vrot.slane %v688_v17, %v2285_v36  ;;  %v703_v44 = vrot.slane %v689_v14, %v2285_v36 }
  0xe1   : > { %v1136_v24 = vcombine.low %v2503_v2, %v2526_v35  ;;  %v1168_v28 = vcombine.low %v1112_v41, %v2549_v1  ;;  %v1137_v33 = vcombine.high %v2503_v2, %v2526_v35  ;;  %v1169_v58 = vcombine.high %v1112_v41, %v2549_v1 }
  0xe2   : > { %v953_v41 = vcombine.high %v2554_v51, %v2539_v21 }
  0xe3   : > { %1618 = vperm.xlu1 %2044, %v1366_v0   ;;  %1597 = vperm.xlu0 %2043, %v1103_v63   ;;  %v1144_v52 = vrot.slane %v1136_v24, %v2276_v30  ;;  %v656_v63 = vcombine.low %v591_v54, %v2569_v43  ;;  %v1176_v4 = vrot.slane %v1168_v28, %v2285_v36 }
  0xe4   : > { %v2556_v20 = vpop.permute.xlu1 %290  ;;  %v431_v16 = vpop.permute.xlu0 %430  ;;  %v657_v24 = vcombine.high %v591_v54, %v2569_v43  ;;  %v1151_v39 = vrot.slane %v1137_v33, %v2276_v30  ;;  %v1183_v22 = vrot.slane %v1169_v58, %v2285_v36 }
  0xe5   : > { %v1152_v42 = vcombine.low %v2528_v5, %v431_v16  ;;  %v1153_v13 = vcombine.high %v2528_v5, %v431_v16  ;;  %v664_v0 = vrot.slane %v656_v63, %v2285_v36  ;;  %v1135_v16 = vrot.slane %v1121_v31, %v2276_v30 }
  0xe6   : > { %v671_v54 = vrot.slane %v657_v24, %v2285_v36 }
  0xe7   : > { %v1160_v53 = vrot.slane %v1152_v42, %v2276_v30  ;;  %1579 = vperm.xlu1 %2044, %v969_v45   ;;  %1555 = vperm.xlu0 %2043, %v705_v46   ;;  %v1167_v9 = vrot.slane %v1153_v13, %v2276_v30  ;;  %v706_v6 = vcombine.low %v664_v0, %v696_v15 }
  0xe8   : > { %v2580_v56 = vpop.permute.xlu1 %338  ;;  %v2582_v57 = vpop.permute.xlu0 %314  ;;  %v1119_v42 = vrot.slane %v1105_v49, %v2276_v30 }
  0xe9   : > { %v1200_v61 = vcombine.low %v1144_v52, %v1160_v53  ;;  %v1384_v27 = vcombine.low %v2556_v20, %v2580_v56  ;;  %v1368_v47 = vcombine.low %v2250_v8, %v2582_v57  ;;  %v1201_v34 = vcombine.high %v1144_v52, %v1160_v53 }
  0xea   : > { %v1216_v43 = vcombine.low %v1151_v39, %v1167_v9  ;;  %v921_v52 = vcombine.high %v2561_v60, %v2544_v38  ;;  %v1184_v53 = vcombine.low %v1119_v42, %v1135_v16  ;;  %v1385_v55 = vcombine.high %v2556_v20, %v2580_v56 }
  0xeb   : > { %v1208_v10 = vrot.slane %v1200_v61, %v2285_v36  ;;  %1621 = vperm.xlu1 %2044, %v1367_v3   ;;  %v2603_v5 = vrot.slane %v1384_v27, %v2276_v30  ;;  %v2606_v18 = vrot.slane %v1368_v47, %v2276_v30  ;;  %v1215_v1 = vrot.slane %v1201_v34, %v2285_v36 }
  0xec   : > { %v387_v29 = vpop.permute.xlu1 %386  ;;  %v363_v32 = vpop.permute.xlu0 %362  ;;  %v1369_v21 = vcombine.high %v2250_v8, %v2582_v57  ;;  %v1217_v17 = vcombine.high %v1151_v39, %v1167_v9  ;;  %v707_v61 = vcombine.low %v671_v54, %v703_v44  ;;  %v1224_v63 = vrot.slane %v1216_v43, %v2285_v36  ;;  %v1501_v9 = vld [vmem:[%s2793_s1] sm:$0xff] }
  0xed   : > { %v1232_v11 = vcombine.low %v1176_v4, %v1208_v10  ;;  %v1432_v40 = vcombine.low %v2606_v18, %v2603_v5  ;;  %v1233_v28 = vcombine.low %v1183_v22, %v1215_v1  ;;  %v967_v38 = vrot.slane %v953_v41, %v2285_v36 }
  0xee   : > { %v1185_v56 = vcombine.high %v1119_v42, %v1135_v16  ;;  %v1192_v8 = vrot.slane %v1184_v53, %v2285_v36  ;;  %v935_v57 = vrot.slane %v921_v52, %v2285_v36  ;;  %v1399_v27 = vrot.slane %v1385_v55, %v2276_v30 }
  0xef   : > { %1600 = vperm.xlu0 %2043, %v1232_v11   ;;  %1582 = vperm.xlu1 %2044, %v970_v50   ;;  %v1440_v51 = vrot.slane %v1432_v40, %v2285_v36  ;;  %v1383_v47 = vrot.slane %v1369_v21, %v2276_v30  ;;  %v1433_v4 = vcombine.high %v2606_v18, %v2603_v5 }
  0xf0   : > { %v435_v2 = vpop.permute.xlu1 %434  ;;  %v411_v35 = vpop.permute.xlu0 %410  ;;  %v971_v10 = vcombine.low %v935_v57, %v967_v38  ;;  %v1231_v13 = vrot.slane %v1217_v17, %v2285_v36  ;;  %v1234_v62 = vcombine.low %v1192_v8, %v1224_v63  ;;  %v1199_v11 = vrot.slane %v1185_v56, %v2285_v36 }
  0xf1   : > { %v1416_v59 = vcombine.low %v387_v29, %v435_v2  ;;  %v1400_v37 = vcombine.low %v363_v32, %v411_v35  ;;  %v1417_v45 = vcombine.high %v387_v29, %v435_v2  ;;  %v1401_v46 = vcombine.high %v363_v32, %v411_v35 }
  0xf2   : > { %v1448_v15 = vcombine.low %v1383_v47, %v1399_v27  ;;  %v1449_v31 = vcombine.high %v1383_v47, %v1399_v27  ;;  %v1235_v33 = vcombine.low %v1199_v11, %v1231_v13  ;;  %v2079_v2 = vmov 0.0  }
  0xf3   : > { %v1424_v7 = vrot.slane %v1416_v59, %v2276_v30  ;;  %v1408_v48 = vrot.slane %v1400_v37, %v2276_v30  ;;  %1558 = vperm.xlu0 %2043, %v706_v6   ;;  %v1431_v60 = vrot.slane %v1417_v45, %v2276_v30  ;;  %v1415_v3 = vrot.slane %v1401_v46, %v2276_v30 }
  0xf4   : > { %v1447_v30 = vrot.slane %v1433_v4, %v2285_v36  ;;  %v1463_v18 = vrot.slane %v1449_v31, %v2285_v36  ;;  %v1456_v0 = vrot.slane %v1448_v15, %v2285_v36  ;;  %2002 = vmatprep.subr.mxu0 %v2079_v2  ;;  %2004 = vmatprep.mubr.msk.f32.mxu0 %vm2080_vm0, %v2079_v2 }
  0xf5   : > { %v1464_v23 = vcombine.low %v1408_v48, %v1424_v7  ;;  %v1465_v26 = vcombine.high %v1408_v48, %v1424_v7  ;;  %v1480_v29 = vcombine.low %v1415_v3, %v1431_v60  ;;  %v1481_v32 = vcombine.high %v1415_v3, %v1431_v60 }
  0xf7   : > { %1603 = vperm.xlu0 %2043, %v1233_v28   ;;  %v1472_v12 = vrot.slane %v1464_v23, %v2285_v36  ;;  %v1479_v34 = vrot.slane %v1465_v26, %v2285_v36  ;;  %v1495_v58 = vrot.slane %v1481_v32, %v2285_v36  ;;  %v1488_v5 = vrot.slane %v1480_v29, %v2285_v36 }
  0xf8   : > { %v1636_v23 = vand.u32 127, %v449_v19 }
  0xf9   : > { %v1496_v20 = vcombine.low %v1440_v51, %v1472_v12  ;;  %v1497_v50 = vcombine.low %v1447_v30, %v1479_v34  ;;  %v1499_v14 = vcombine.low %v1463_v18, %v1495_v58  ;;  %v1498_v49 = vcombine.low %v1456_v0, %v1488_v5 }
  0xfa   : > { %v1641_v53 = vadd.s32 4294967288, %v1636_v23  ;;  %v1648_v54 = vadd.s32 4294967280, %v1636_v23  ;;  %v1655_v55 = vadd.s32 4294967272, %v1636_v23  ;;  %v1662_v51 = vadd.s32 4294967264, %v1636_v23 }
  0xfb   : > { %1561 = vperm.xlu0 %2043, %v707_v61   ;;  %1624 = vperm.xlu1 %2044, %v1496_v20   ;;  %v1669_v12 = vadd.s32 4294967256, %v1636_v23  ;;  %v1639_v61 = vsub.s32 %v1636_v23, %v2273_v25  ;;  %v1676_v3 = vadd.s32 4294967248, %v1636_v23  ;;  %v1683_v4 = vadd.s32 4294967240, %v1636_v23 }
  0xfc   : > { %v1644_v17 = vsub.s32 %v1641_v53, %v2273_v25  ;;  %v2692_v63 = vsub.s32 %v1648_v54, %v2273_v25  ;;  %v2695_v19 = vsub.s32 %v1655_v55, %v2273_v25  ;;  %v2702_v56 = vsub.s32 %v1662_v51, %v2273_v25 }
  0xfd   : > { %v2705_v8 = vsub.s32 %v1669_v12, %v2273_v25  ;;  %v1679_v31 = vsub.s32 %v1676_v3, %v2273_v25  ;;  %v1686_v0 = vsub.s32 %v1683_v4, %v2273_v25 }
  0xff   : > { %1606 = vperm.xlu0 %2043, %v1234_v62   ;;  %1585 = vperm.xlu1 %2044, %v971_v10  }
 0x103   : > { %1609 = vperm.xlu0 %2043, %v1235_v33   ;;  %1627 = vperm.xlu1 %2044, %v1497_v50  }
 0x107   : > { %1633 = vperm.xlu0 %2043, %v1499_v14   ;;  %1630 = vperm.xlu1 %2044, %v1498_v49  }
 0x10b   : > { %1504 = vperm.xlu1 %2044, %v1501_v9  }
 0x126   : > { %v2656_v35 = vpop.permute.xlu1 %1543  ;;  %v1541_v37 = vpop.permute.xlu0 %1540 }
 0x127   : > { %v1645_v57 = vrot.slane %v2656_v35, %v1644_v17  ;;  %v1640_v27 = vrot.slane %v1541_v37, %v1639_v61 }
 0x129   : > { %v1647_v5 = vsel %vm1646_vm1, %v1645_v57, %v1640_v27 }
 0x12a   : > { %v1565_v59 = vpop.permute.xlu1 %1564  ;;  %v1568_v36 = vpop.permute.xlu0 %1567 }
 0x12b   : > { %v1693_v26 = vrot.slane %v1565_v59, %v1639_v61  ;;  %v1697_v20 = vrot.slane %v1568_v36, %v1644_v17 }
 0x12d   : > { %v1698_v30 = vsel %vm1646_vm1, %v1697_v20, %v1693_v26 }
 0x12e   : > { %v2658_v6 = vpop.permute.xlu1 %1546  ;;  %v1571_v24 = vpop.permute.xlu0 %1570 }
 0x12f   : > { %v1702_v47 = vrot.slane %v1571_v24, %v2692_v63  ;;  %v1652_v10 = vrot.slane %v2658_v6, %v2692_v63 }
 0x131   : > { %v1703_v18 = vsel %vm1653_vm2, %v1702_v47, %v1698_v30  ;;  %v1654_v14 = vsel %vm1653_vm2, %v1652_v10, %v1647_v5 }
 0x136   : > { %v2660_v1 = vpop.permute.xlu1 %1588  ;;  %v1592_v39 = vpop.permute.xlu0 %1591 }
 0x137   : > { %v1732_v13 = vrot.slane %v2660_v1, %v1639_v61  ;;  %v1736_v29 = vrot.slane %v1592_v39, %v1644_v17 }
 0x139   : > { %v1737_v49 = vsel %vm1646_vm1, %v1736_v29, %v1732_v13 }
 0x13a   : > { %v2662_v16 = vpop.permute.xlu1 %1549  ;;  %v1574_v7 = vpop.permute.xlu0 %1573 }
 0x13b   : > { %v1707_v32 = vrot.slane %v1574_v7, %v2695_v19  ;;  %v1659_v11 = vrot.slane %v2662_v16, %v2695_v19 }
 0x13d   : > { %v1708_v9 = vsel %vm1660_vm3, %v1707_v32, %v1703_v18  ;;  %v1661_v59 = vsel %vm1660_vm3, %v1659_v11, %v1654_v14  ;;  %v1500_v32 = vld [vmem:[%s2792_s0] sm:$0xff] }
 0x13e   : > { %v2664_v40 = vpop.permute.xlu1 %1594 }
 0x13f   : > { %v1741_v15 = vrot.slane %v2664_v40, %v2692_v63 }
 0x141   : > { %v1742_v37 = vsel %vm1653_vm2, %v1741_v15, %v1737_v49  ;;  %v1890_v15 = vld [vmem:[%s252_s11] sm:$0xff] }
 0x142   : > { %v2666_v48 = vpop.permute.xlu1 %1615  ;;  %v2668_v22 = vpop.permute.xlu0 %1612 }
 0x143   : > { %v1775_v33 = vrot.slane %v2666_v48, %v1644_v17  ;;  %v1771_v50 = vrot.slane %v2668_v22, %v1639_v61 }
 0x145   : > { %v1776_v36 = vsel %vm1646_vm1, %v1775_v33, %v1771_v50 }
 0x15e   : > { %v2670_v41 = vpop.permute.xlu1 %1576  ;;  %v2672_v42 = vpop.permute.xlu0 %1552 }
 0x15f   : > { %v1712_v58 = vrot.slane %v2670_v41, %v2702_v56  ;;  %v1666_v6 = vrot.slane %v2672_v42, %v2702_v56 }
 0x161   : > { %v1713_v1 = vsel %vm1667_vm4, %v1712_v58, %v1708_v9 }
 0x162   : > { %v2674_v43 = vpop.permute.xlu1 %1618  ;;  %v2676_v44 = vpop.permute.xlu0 %1597 }
 0x163   : > { %v1746_v25 = vrot.slane %v2676_v44, %v2695_v19  ;;  %v1780_v39 = vrot.slane %v2674_v43, %v2692_v63 }
 0x165   : > { %v1747_v43 = vsel %vm1660_vm3, %v1746_v25, %v1742_v37 }
 0x166   : > { %v2678_v45 = vpop.permute.xlu1 %1579  ;;  %v2680_v46 = vpop.permute.xlu0 %1555 }
 0x167   : > { %v1717_v24 = vrot.slane %v2678_v45, %v2705_v8  ;;  %v1673_v40 = vrot.slane %v2680_v46, %v2705_v8 }
 0x169   : > { %v1718_v54 = vsel %vm1674_vm5, %v1717_v24, %v1713_v1 }
 0x16a   : > { %v2685_v52 = vpop.permute.xlu1 %1621 }
 0x16b   : > { %v1785_v22 = vrot.slane %v2685_v52, %v2695_v19 }
 0x16e   : > { %v2683_v28 = vpop.permute.xlu0 %1600  ;;  %v2697_v38 = vpop.permute.xlu1 %1582 }
 0x16f   : > { %v1751_v16 = vrot.slane %v2683_v28, %v2702_v56  ;;  %v1722_v7 = vrot.slane %v2697_v38, %v1679_v31  ;;  %v1668_v28 = vsel %vm1667_vm4, %v1666_v6, %v1661_v59 }
 0x170   : > { %v1675_v12 = vsel %vm1674_vm5, %v1673_v40, %v1668_v28 }
 0x171   : > { %v1752_v55 = vsel %vm1667_vm4, %v1751_v16, %v1747_v43  ;;  %v1723_v17 = vsel %vm1681_vm6, %v1722_v7, %v1718_v54 }
 0x172   : > { %v2687_v21 = vpop.permute.xlu0 %1558 }
 0x173   : > { %v1680_v41 = vrot.slane %v2687_v21, %v1679_v31  ;;  %v1781_v21 = vsel %vm1653_vm2, %v1780_v39, %v1776_v36 }
 0x174   : > { %v1786_v63 = vsel %vm1660_vm3, %v1785_v22, %v1781_v21 }
 0x175   : > { %v1682_v19 = vsel %vm1681_vm6, %v1680_v41, %v1675_v12 }
 0x176   : > { %v2699_v60 = vpop.permute.xlu0 %1603 }
 0x177   : > { %v1756_v48 = vrot.slane %v2699_v60, %v2705_v8 }
 0x179   : > { %v1757_v61 = vsel %vm1674_vm5, %v1756_v48, %v1752_v55 }
 0x17a   : > { %v1625_v62 = vpop.permute.xlu1 %1624  ;;  %v1562_v34 = vpop.permute.xlu0 %1561 }
 0x17b   : > { %v1790_v46 = vrot.slane %v1625_v62, %v2702_v56  ;;  %v1687_v51 = vrot.slane %v1562_v34, %v1686_v0 }
 0x17d   : > { %v1791_v20 = vsel %vm1667_vm4, %v1790_v46, %v1786_v63  ;;  %v1689_v27 = vsel %vm1688_vm7, %v1687_v51, %v1682_v19 }
 0x17e   : > { %v1586_v2 = vpop.permute.xlu1 %1585  ;;  %v1607_v35 = vpop.permute.xlu0 %1606 }
 0x17f   : > { %v1727_v42 = vrot.slane %v1586_v2, %v1686_v0  ;;  %v1761_v44 = vrot.slane %v1607_v35, %v1679_v31 }
 0x181   : > { %v1728_v38 = vsel %vm1688_vm7, %v1727_v42, %v1723_v17  ;;  %v1762_v60 = vsel %vm1681_vm6, %v1761_v44, %v1757_v61 }
 0x182   : > { %v1628_v45 = vpop.permute.xlu1 %1627  ;;  %v1610_v23 = vpop.permute.xlu0 %1609  ;;  %v1808_v10 = vsel %vm1807_vm8, %v1728_v38, %v1689_v27 }
 0x183   : > { %v1766_v53 = vrot.slane %v1610_v23, %v1686_v0  ;;  %v1795_v52 = vrot.slane %v1628_v45, %v2705_v8 }
 0x185   : > { %v1767_v56 = vsel %vm1688_vm7, %v1766_v53, %v1762_v60  ;;  %v1796_v47 = vsel %vm1674_vm5, %v1795_v52, %v1791_v20 }
 0x186   : > { %v1631_v3 = vpop.permute.xlu1 %1630  ;;  %v1634_v26 = vpop.permute.xlu0 %1633  ;;  %v1810_v29 = vsel %vm1809_vm9, %v1767_v56, %v1808_v10 }
 0x187   : > { %v1800_v8 = vrot.slane %v1631_v3, %v1679_v31  ;;  %v1805_v57 = vrot.slane %v1634_v26, %v1686_v0 }
 0x189   : > { %v1801_v4 = vsel %vm1681_vm6, %v1800_v8, %v1796_v47 }
 0x18a   : > { %v1806_v13 = vsel %vm1688_vm7, %v1805_v57, %v1801_v4  ;;  %v1505_v34 = vpop.permute.xlu1 %1504 }
 0x18b   : > { %v1812_v62 = vsel %vm1811_vm10, %v1806_v13, %v1810_v29 }
 0x18c   : > { %2003 = vmatpush3.msk.msra.mxu0 %vm1817_vm11, %v1812_v62 }
 0x18d   : > { %2005 = vmatmul.mubr.msk.f32.vlgmr.msra.gmra.mrb[0].mxu0 %vm1813_vm12, %v1500_v32 }
 0x260   : > { %v1886_v11 = vpop.f32.mrb[0].mxu0 }
 0x261   : > { %v1887_v31 = vadd.f32 %v1886_v11, %v1505_v34  ;;  %v2006_v30 = vpop.f32.mrb[1].mxu0 }
 0x263   : > { %v1891_v33 = vadd.f32 %v1890_v15, %v1887_v31 }
 0x265   : > { %1893 = vst.msk [vmem:[%s259_s14] sm:$0xff] %vm1892_vm13, %v1891_v33 }
 0x266 PF: > { %s14_s17 = sadd.s32 1, %s2067_s17   ;;  %s2797_s15 = smov %s2063_s16 }
 0x267   : > { %p11_p5 = scmp.ge.s32.totalorder %s14_s17, 4   ;;  %s2798_s16 = smov %s2800_s18 }
 0x269   :  { %13 = sbr.rel (!%p11_p5) target bundleno = 2 (0x2), region = 69 }

// kernel: _conv1x1_add_flat.1
= control target key start
LH: loop header
LB: loop body
LE: loop exit
PB: predicated region body
PF: predicated region fallthrough
CT: control target
= control target key end

     0   :  { %s530_s15 = smov 0   ;;  %s532_s16 = smov 0   ;;  %s572_s0 = inlined_call_operand.vmem [shape: f32[8,4], index: 0, kind: input, shape index: {}]   ;;  %s573_s1 = inlined_call_operand.vmem [shape: f32[8,1], index: 1, kind: input, shape index: {}]   ;;  %s574_s2 = inlined_call_operand.vmem [shape: f32[2,4,64], index: 2, kind: input, shape index: {}]   ;;  %s575_s3 = inlined_call_operand.vmem [shape: f32[2,8,64], index: 3, kind: input, shape index: {}]   ;;  %s576_s4 = inlined_call_operand.vmem [shape: f32[2,8,64], index: 4, kind: output, shape index: {}]  }
   0x1   :  { %s534_s17 = smov 0  }
   0x2 LB: > { %s26_s18 = sadd.s32 1, %s496_s16  ;;  %p435_p0 = scmp.ge.s32.totalorder %s500_s17, 1  ;;  %s500_s17 = sphi %s534_s17, %s14_s17   ;;  %s496_s16 = sphi %s532_s16, %s578_s16   ;;  %s492_s15 = sphi %s530_s15, %s577_s15  }
   0x3   : > { %p28_p1 = scmp.ge.s32.totalorder %s26_s18, 2  ;;  %p194_p2 = scmp.lt.s32.totalorder %s500_s17, 3 }
   0x5   : > { %s580_s18 = smov (%p28_p1, %s26_s18), 0  ;;  %p195_p3 = pnand %p435_p0, %p194_p2 }
   0x6   : > { %p231_p4 = scmp.lt.s32.totalorder (!%p195_p3), %s492_s15, 1  ;;  %v502_v0 = vmov (!%p195_p3), 0.0   ;;  %vm503_vm0 = vmmov (!%p195_p3), 0   ;;  %v254_v1 = vld [vmem:[%s573_s1] sm:$0xff] (!%p195_p3)  ;;  %v504_v2 = vmov (!%p195_p3), 0   ;;  %vm264_vm1 = vcmask (!%p195_p3), 1043456  }
   0x7   : > { %198 = sbr.rel (%p195_p3) target bundleno = 236 (0xec), region = 36  ;;  %445 = vmatprep.subr.mxu0 (!%p195_p3), %v502_v0  ;;  %447 = vmatprep.mubr.msk.f32.mxu0 (!%p195_p3), %vm503_vm0, %v502_v0  ;;  %v252_v3 = vld [vmem:[%s572_s0] sm:$0xff] (!%p195_p3)  ;;  %vm260_vm2 = vcmask (!%p195_p3), 31744   ;;  %vm340_vm3 = vcmask (!%p195_p3), 523264  }
   0x8   : > { %477 = vset.pattern.permute.xlu0 (!%p195_p3), %v504_v2 }
   0x9   : > { %257 = vperm.xlu0 (!%p195_p3), %477, %v254_v1  }
   0xe   : > { %s582_s15 = smov (!%p231_p4, %s492_s15), 1 }
   0xf   : > { %s436_s21 = sshll.u32 %s582_s15, 2  ;;  %s437_s27 = sshll.u32 %s582_s15, 3 }
  0x10   : > { %s237_s24 = scalar_lea.vmem %s574_s2, %s436_s21  ;;  %s244_s30 = scalar_lea.vmem %s575_s3, %s437_s27 }
  0x11   : > { %v253_v4 = vld [vmem:[%s237_s24] sm:$0xf]  ;;  %s251_s7 = scalar_lea.vmem %s576_s4, %s437_s27 }
  0x12   : > { %446 = vmatpush3.msk.msra.mxu0 %vm264_vm1, %v253_v4  ;;  %v338_v7 = vld [vmem:[%s244_s30] sm:$0xff] }
  0x13   : > { %448 = vmatmul.mubr.msk.f32.vlgmr.msra.gmra.mrb[0].mxu0 %vm260_vm2, %v252_v3 }
  0x88   : > { %v258_v5 = vpop.permute.xlu0 %257 }
  0xe6   : > { %v334_v6 = vpop.f32.mrb[0].mxu0 }
  0xe7   : > { %v335_v8 = vadd.f32 %v334_v6, %v258_v5  ;;  %v449_v9 = vpop.f32.mrb[1].mxu0 }
  0xe9   : > { %v339_v10 = vadd.f32 %v338_v7, %v335_v8 }
  0xeb   : > { %341 = vst.msk [vmem:[%s251_s7] sm:$0xff] %vm340_vm3, %v339_v10 }
  0xec PF: > { %s14_s17 = sadd.s32 1, %s500_s17   ;;  %s577_s15 = smov %s496_s16 }
  0xed   : > { %p11_p5 = scmp.ge.s32.totalorder %s14_s17, 4   ;;  %s578_s16 = smov %s580_s18 }
  0xef   :  { %13 = sbr.rel (!%p11_p5) target bundleno = 2 (0x2), region = 69 }

</bundles_post_ra>
